<compile_context>
chip_gen: v7x
topology: tpu7x:2x2x1
jax: 0.10.0
libtpu: 0.0.40
codegen_flags: <defaults>
</compile_context>

<pallas_src>
import jax
import jax.numpy as jnp
from jax.experimental import pallas as pl
from jax.experimental.pallas import tpu as pltpu


_LANE_WIDTHS = (1024, 512, 256, 128)     # candidate lane-dense last dims
_TARGET_BLOCK_BYTES = 2 << 20            # ~2 MiB per block buffer (any dtype)


def _glu_kernel(x_ref, o_ref):
    # Gate math in f32 (EUP sigmoid; v5e has no bf16 VPU/EUP path).
    xf = x_ref[...].astype(jnp.float32)
    o_ref[...] = (xf * jax.nn.sigmoid(xf)).astype(o_ref.dtype)


def _pick_block_rows(rows, width, itemsize, total_bytes):
    """Byte-based block sizing, multiple-of-8 rows, >=2 grid steps on big inputs."""
    block_rows = max(8, (_TARGET_BLOCK_BYTES // (width * itemsize)) // 8 * 8)
    # v7x: guarantee at least 2 grid steps once the tensor exceeds ~1 MiB so
    # both TensorCores get work (no effect on single-TC v5e/v6e).
    if total_bytes > (1 << 20) and rows >= 16:
        half_rows = (((rows + 1) // 2) + 7) // 8 * 8
        block_rows = min(block_rows, half_rows)
    if block_rows >= rows:
        block_rows = rows     # single block == full array dims -> (8,128) rule OK
    return block_rows


def _glu_2d(flat2d, block_rows):
    rows, width = flat2d.shape
    grid = (pl.cdiv(rows, block_rows),)   # partial edge block masked by Pallas
    return pl.pallas_call(
        _glu_kernel,
        out_shape=jax.ShapeDtypeStruct((rows, width), flat2d.dtype),
        grid_spec=pltpu.PrefetchScalarGridSpec(
            num_scalar_prefetch=0,
            grid=grid,
            in_specs=[pl.BlockSpec((block_rows, width), lambda i: (i, 0))],
            out_specs=pl.BlockSpec((block_rows, width), lambda i: (i, 0)),
        ),
        compiler_params=pltpu.CompilerParams(
            dimension_semantics=("parallel",),
        ),
    )(flat2d)


@jax.jit
def glu_pallas(x):
    """GLU (no channel split): x * sigmoid(x), any shape / float dtype."""
    shape, dtype = x.shape, x.dtype
    n = x.size
    if n == 0:
        return x
    itemsize = dtype.itemsize

    # Fast path: lane-dense (rows, W) view with W a multiple of 128 that
    # divides n exactly -> pure (free) reshape, no pad, no slice.
    width = next((w for w in _LANE_WIDTHS if n % w == 0), None)
    if width is not None:
        rows = n // width
        block_rows = _pick_block_rows(rows, width, itemsize, n * itemsize)
        out = _glu_2d(x.reshape(rows, width), block_rows)
        return out.reshape(shape)

    # Ragged fallback: size is not a multiple of 128, so no lane-dense view
    # exists without padding.  Costs one extra HBM pass for the pad and one
    # for the slice; only ever taken for oddly-sized tensors.
    # TODO(synk): handle the ragged tail in-kernel (masked store on the last
    # block) to drop these two extra HBM passes as well.
    width = 128
    rows = pl.cdiv(n, width)
    padded = rows * width
    flat = jnp.pad(x.reshape(-1), (0, padded - n)).reshape(rows, width)
    block_rows = _pick_block_rows(rows, width, itemsize, padded * itemsize)
    out = _glu_2d(flat, block_rows)
    return out.reshape(-1)[:n].reshape(shape)


if __name__ == "__main__":
    key = jax.random.PRNGKey(0)
    k1, k2, k3 = jax.random.split(key, 3)

    # (B, C, T) activation tensor, as the GLU block sees inside the
    # CycleGAN-VC generator.  16384 elems -> free (16, 1024) view, no padding.
    x = jax.random.normal(k1, (2, 128, 64), jnp.float32)
    out = jax.block_until_ready(glu_pallas(x))
    ref = x * jax.nn.sigmoid(x)
    assert out.shape == x.shape, out.shape
    assert out.dtype == x.dtype, out.dtype
    assert jnp.allclose(out, ref, atol=1e-6, rtol=1e-6), float(
        jnp.max(jnp.abs(out - ref))
    )

    # bf16 input: exercises the byte-based (dtype-aware) block sizing.
    xb = jax.random.normal(k2, (4, 96, 256), jnp.bfloat16)
    outb = jax.block_until_ready(glu_pallas(xb))
    xbf = xb.astype(jnp.float32)
    refb = (xbf * jax.nn.sigmoid(xbf)).astype(jnp.bfloat16)
    assert outb.shape == xb.shape and outb.dtype == xb.dtype
    assert jnp.allclose(outb.astype(jnp.float32), refb.astype(jnp.float32),
                        atol=2e-2, rtol=2e-2)

    # Ragged size (105 elements, not a multiple of 128): fallback path.
    xr = jax.random.normal(k3, (3, 5, 7), jnp.float32)
    outr = jax.block_until_ready(glu_pallas(xr))
    refr = xr * jax.nn.sigmoid(xr)
    assert outr.shape == xr.shape and outr.dtype == xr.dtype
    assert jnp.allclose(outr, refr, atol=1e-6, rtol=1e-6), float(
        jnp.max(jnp.abs(outr - refr))
    )

    print("KERNEL_OK")
</pallas_src>

<mosaic_0001>
module attributes {stable_mosaic.version = 11 : i64} {
  func.func @_glu_kernel(%arg0: i32, %arg1: memref<16x1024xf32, #tpu.memory_space<vmem>>, %arg2: memref<16x1024xf32, #tpu.memory_space<vmem>>) attributes {dimension_semantics = [#tpu.dimension_semantics<parallel>], iteration_bounds = array<i64: 1>, scalar_prefetch = 0 : i64, scratch_operands = 0 : i64, tpu.core_type = #tpu.core_type<tc>, window_params = [{transform_indices = @transform_0, window_bounds = array<i64: 16, 1024>}, {transform_indices = @transform_1, window_bounds = array<i64: 16, 1024>}]} {
    %c0 = arith.constant 0 : index
    %c0_0 = arith.constant 0 : index
    %0 = vector.load %arg1[%c0, %c0_0] : memref<16x1024xf32, #tpu.memory_space<vmem>>, vector<16x1024xf32>
    %1 = arith.negf %0 : vector<16x1024xf32>
    %2 = math.exp %1 : vector<16x1024xf32>
    %cst = arith.constant 1.000000e+00 : f32
    %3 = vector.broadcast %cst : f32 to vector<16x1024xf32>
    %4 = arith.addf %3, %2 : vector<16x1024xf32>
    %5 = arith.divf %3, %4 : vector<16x1024xf32>
    %6 = arith.mulf %0, %5 : vector<16x1024xf32>
    %c0_1 = arith.constant 0 : index
    %c0_2 = arith.constant 0 : index
    %7 = vector.load %arg2[%c0_1, %c0_2] : memref<16x1024xf32, #tpu.memory_space<vmem>>, vector<16x1024xf32>
    tpu.vector_store %arg2[%c0_1, %c0_2], %6 {strides = array<i32>} : memref<16x1024xf32, #tpu.memory_space<vmem>>, vector<16x1024xf32>,
    return
  }
  func.func @transform_0(%arg0: i32) -> (i32, i32) {
    %c0_i32 = arith.constant 0 : i32
    %c0_i32_0 = arith.constant 0 : i32
    return %arg0, %c0_i32 : i32, i32
  }
  func.func @transform_1(%arg0: i32) -> (i32, i32) {
    %c0_i32 = arith.constant 0 : i32
    %c0_i32_0 = arith.constant 0 : i32
    return %arg0, %c0_i32 : i32, i32
  }
}

</mosaic_0001>

<bundles_post_ra>
// kernel: glu_pallas.1
= control target key start
LH: loop header
LB: loop body
LE: loop exit
PB: predicated region body
PF: predicated region fallthrough
CT: control target
= control target key end

     0   :  { %s406_s0 = inlined_call_operand.vmem [shape: f32[16,1024], index: 0, kind: input, shape index: {}]   ;;  %s407_s1 = inlined_call_operand.vmem [shape: f32[16,1024], index: 1, kind: output, shape index: {}]  }
   0x1   :  { %v249_v0 = vld [vmem:[%s406_s0] sm:$0xff]  ;;  %v254_v1 = vld [vmem:[%s406_s0 + $0x8] sm:$0xff]  ;;  %v259_v2 = vld [vmem:[%s406_s0 + $0x10] sm:$0xff] }
   0x2   :  { %v156_v3 = vmul.f32 -1.442695, %v249_v0  ;;  %v157_v4 = vmul.f32 -1.442695, %v254_v1  ;;  %v158_v5 = vmul.f32 -1.442695, %v259_v2 }
   0x3   :  { %v267_v6 = vld [vmem:[%s406_s0 + $0x18] sm:$0xff]  ;;  %v272_v7 = vld [vmem:[%s406_s0 + $0x20] sm:$0xff]  ;;  %v277_v8 = vld [vmem:[%s406_s0 + $0x28] sm:$0xff] }
   0x4   :  { %172 = vpow2.f32 %v156_v3  ;;  %v159_v9 = vmul.f32 -1.442695, %v267_v6  ;;  %v160_v10 = vmul.f32 -1.442695, %v272_v7  ;;  %v161_v11 = vmul.f32 -1.442695, %v277_v8 }
   0x5   :  { %174 = vpow2.f32 %v157_v4  ;;  %v285_v12 = vld [vmem:[%s406_s0 + $0x30] sm:$0xff]  ;;  %v290_v13 = vld [vmem:[%s406_s0 + $0x38] sm:$0xff]  ;;  %v295_v14 = vld [vmem:[%s406_s0 + $0x40] sm:$0xff] }
   0x6   :  { %176 = vpow2.f32 %v158_v5  ;;  %v162_v15 = vmul.f32 -1.442695, %v285_v12  ;;  %v163_v16 = vmul.f32 -1.442695, %v290_v13  ;;  %v302_v17 = vld [vmem:[%s406_s0 + $0x48] sm:$0xff]  ;;  %v307_v18 = vld [vmem:[%s406_s0 + $0x50] sm:$0xff] }
   0x7   :  { %178 = vpow2.f32 %v159_v9  ;;  %v164_v19 = vmul.f32 -1.442695, %v295_v14  ;;  %v313_v20 = vld [vmem:[%s406_s0 + $0x58] sm:$0xff]  ;;  %v165_v21 = vmul.f32 -1.442695, %v302_v17  ;;  %v319_v22 = vld [vmem:[%s406_s0 + $0x60] sm:$0xff] }
   0x8   :  { %180 = vpow2.f32 %v160_v10  ;;  %v166_v23 = vmul.f32 -1.442695, %v307_v18  ;;  %v167_v24 = vmul.f32 -1.442695, %v313_v20  ;;  %v168_v25 = vmul.f32 -1.442695, %v319_v22 }
   0x9   :  { %182 = vpow2.f32 %v161_v11  ;;  %v327_v45 = vld [vmem:[%s406_s0 + $0x68] sm:$0xff]  ;;  %v332_v48 = vld [vmem:[%s406_s0 + $0x70] sm:$0xff]  ;;  %v337_v51 = vld [vmem:[%s406_s0 + $0x78] sm:$0xff] }
   0xa   :  { %184 = vpow2.f32 %v162_v15  ;;  %v169_v54 = vmul.f32 -1.442695, %v327_v45  ;;  %v170_v57 = vmul.f32 -1.442695, %v332_v48  ;;  %v171_v60 = vmul.f32 -1.442695, %v337_v51 }
   0xb   :  { %186 = vpow2.f32 %v163_v16 }
   0xc   :  { %188 = vpow2.f32 %v164_v19 }
   0xd   :  { %190 = vpow2.f32 %v165_v21 }
   0xe   :  { %v173_v26 = vpop.eup %172  ;;  %192 = vpow2.f32 %v166_v23 }
   0xf   :  { %v175_v27 = vpop.eup %174  ;;  %v72_v28 = vadd.f32 1.0, %v173_v26  ;;  %194 = vpow2.f32 %v167_v24 }
  0x10   :  { %v177_v29 = vpop.eup %176  ;;  %v73_v30 = vadd.f32 1.0, %v175_v27  ;;  %196 = vpow2.f32 %v168_v25 }
  0x11   :  { %v179_v31 = vpop.eup %178  ;;  %198 = vrcp.f32 %v72_v28  ;;  %v74_v32 = vadd.f32 1.0, %v177_v29 }
  0x12   :  { %v181_v33 = vpop.eup %180  ;;  %200 = vrcp.f32 %v73_v30  ;;  %v75_v34 = vadd.f32 1.0, %v179_v31 }
  0x13   :  { %v183_v35 = vpop.eup %182  ;;  %202 = vrcp.f32 %v74_v32  ;;  %v76_v36 = vadd.f32 1.0, %v181_v33 }
  0x14   :  { %v185_v37 = vpop.eup %184  ;;  %204 = vrcp.f32 %v75_v34  ;;  %v77_v38 = vadd.f32 1.0, %v183_v35 }
  0x15   :  { %v187_v39 = vpop.eup %186  ;;  %206 = vrcp.f32 %v76_v36  ;;  %v78_v40 = vadd.f32 1.0, %v185_v37 }
  0x16   :  { %v189_v41 = vpop.eup %188  ;;  %208 = vrcp.f32 %v77_v38  ;;  %v79_v42 = vadd.f32 1.0, %v187_v39 }
  0x17   :  { %v191_v43 = vpop.eup %190  ;;  %210 = vrcp.f32 %v78_v40  ;;  %v80_v44 = vadd.f32 1.0, %v189_v41 }
  0x18   :  { %v193_v46 = vpop.eup %192  ;;  %212 = vrcp.f32 %v79_v42  ;;  %v81_v47 = vadd.f32 1.0, %v191_v43 }
  0x19   :  { %v195_v49 = vpop.eup %194  ;;  %214 = vrcp.f32 %v80_v44  ;;  %v82_v50 = vadd.f32 1.0, %v193_v46 }
  0x1a   :  { %v197_v52 = vpop.eup %196  ;;  %216 = vrcp.f32 %v81_v47  ;;  %v83_v53 = vadd.f32 1.0, %v195_v49 }
  0x1b   :  { %v199_v55 = vpop.eup %198  ;;  %218 = vrcp.f32 %v82_v50  ;;  %v84_v56 = vadd.f32 1.0, %v197_v52 }
  0x1c   :  { %v201_v58 = vpop.eup %200  ;;  %v120_v59 = vmul.f32 %v199_v55, %v249_v0  ;;  %220 = vrcp.f32 %v83_v53 }
  0x1d   :  { %v203_v61 = vpop.eup %202  ;;  %v121_v62 = vmul.f32 %v201_v58, %v254_v1  ;;  %222 = vrcp.f32 %v84_v56 }
  0x1e   :  { %v205_v63 = vpop.eup %204  ;;  %136 = vst [vmem:[%s407_s1] sm:$0xff] %v120_v59  ;;  %v122_v3 = vmul.f32 %v203_v61, %v259_v2  ;;  %224 = vpow2.f32 %v169_v54 }
  0x1f   :  { %v207_v4 = vpop.eup %206  ;;  %137 = vst [vmem:[%s407_s1 + $0x8] sm:$0xff] %v121_v62  ;;  %v123_v0 = vmul.f32 %v205_v63, %v267_v6  ;;  %226 = vpow2.f32 %v170_v57 }
  0x20   :  { %v209_v5 = vpop.eup %208  ;;  %138 = vst [vmem:[%s407_s1 + $0x10] sm:$0xff] %v122_v3  ;;  %v124_v1 = vmul.f32 %v207_v4, %v272_v7  ;;  %228 = vpow2.f32 %v171_v60 }
  0x21   :  { %v211_v9 = vpop.eup %210  ;;  %139 = vst [vmem:[%s407_s1 + $0x18] sm:$0xff] %v123_v0  ;;  %v125_v2 = vmul.f32 %v209_v5, %v277_v8 }
  0x22   :  { %v213_v10 = vpop.eup %212  ;;  %140 = vst [vmem:[%s407_s1 + $0x20] sm:$0xff] %v124_v1  ;;  %v126_v6 = vmul.f32 %v211_v9, %v285_v12 }
  0x23   :  { %v215_v11 = vpop.eup %214  ;;  %141 = vst [vmem:[%s407_s1 + $0x28] sm:$0xff] %v125_v2  ;;  %v127_v7 = vmul.f32 %v213_v10, %v290_v13 }
  0x24   :  { %v217_v15 = vpop.eup %216  ;;  %142 = vst [vmem:[%s407_s1 + $0x30] sm:$0xff] %v126_v6  ;;  %v128_v8 = vmul.f32 %v215_v11, %v295_v14 }
  0x25   :  { %v219_v16 = vpop.eup %218  ;;  %143 = vst [vmem:[%s407_s1 + $0x38] sm:$0xff] %v127_v7  ;;  %v129_v12 = vmul.f32 %v217_v15, %v302_v17 }
  0x26   :  { %v221_v19 = vpop.eup %220  ;;  %144 = vst [vmem:[%s407_s1 + $0x40] sm:$0xff] %v128_v8  ;;  %v130_v13 = vmul.f32 %v219_v16, %v307_v18 }
  0x27   :  { %v223_v21 = vpop.eup %222  ;;  %145 = vst [vmem:[%s407_s1 + $0x48] sm:$0xff] %v129_v12  ;;  %v131_v14 = vmul.f32 %v221_v19, %v313_v20 }
  0x28   :  { %v225_v23 = vpop.eup %224  ;;  %146 = vst [vmem:[%s407_s1 + $0x50] sm:$0xff] %v130_v13  ;;  %v132_v17 = vmul.f32 %v223_v21, %v319_v22 }
  0x29   :  { %v227_v24 = vpop.eup %226  ;;  %147 = vst [vmem:[%s407_s1 + $0x58] sm:$0xff] %v131_v14  ;;  %v85_v18 = vadd.f32 1.0, %v225_v23 }
  0x2a   :  { %v229_v25 = vpop.eup %228  ;;  %148 = vst [vmem:[%s407_s1 + $0x60] sm:$0xff] %v132_v17  ;;  %v86_v26 = vadd.f32 1.0, %v227_v24 }
  0x2b   :  { %230 = vrcp.f32 %v85_v18  ;;  %v87_v20 = vadd.f32 1.0, %v229_v25 }
  0x2c   :  { %232 = vrcp.f32 %v86_v26 }
  0x2d   :  { %234 = vrcp.f32 %v87_v20 }
  0x35   :  { %v231_v27 = vpop.eup %230 }
  0x36   :  { %v233_v28 = vpop.eup %232  ;;  %v133_v22 = vmul.f32 %v231_v27, %v327_v45 }
  0x37   :  { %v235_v29 = vpop.eup %234  ;;  %v134_v30 = vmul.f32 %v233_v28, %v332_v48 }
  0x38   :  { %149 = vst [vmem:[%s407_s1 + $0x68] sm:$0xff] %v133_v22  ;;  %v135_v31 = vmul.f32 %v235_v29, %v337_v51 }
  0x39   :  { %150 = vst [vmem:[%s407_s1 + $0x70] sm:$0xff] %v134_v30 }
  0x3a   :  { %151 = vst [vmem:[%s407_s1 + $0x78] sm:$0xff] %v135_v31 }

</bundles_post_ra>
